<compile_context>
chip_gen: v5e
topology: v5e:2x2
jax: 0.10.0
libtpu: 0.0.40
codegen_flags: <defaults>
</compile_context>

<pallas_src>
import functools

import jax
import jax.numpy as jnp
import numpy as np
from jax.experimental import pallas as pl
from jax.experimental.pallas import tpu as pltpu


# ---------------------------------------------------------------------------
# Kernel body (shared by the with-attn / without-attn variants).
# ---------------------------------------------------------------------------
def _mha_body(q_ref, k_ref, v_ref, wq_ref, wk_ref, wv_ref, fcw_ref, fcb_ref,
              g_ref, beta_ref, mask_ref, out_ref, attn_ref, *,
              inv_temperature, eps, n_head, d_k, d_v, matmul_dtype):
    neg_inf = jnp.float32(-1e10)

    q = q_ref[0]          # (tq, d_model) f32 -- also the residual
    k = k_ref[0]          # (len_k, d_model)
    v = v_ref[0]          # (len_v, d_model)

    def mm(a, b):
        # f32 accumulation always; inputs optionally cast to bf16 for the MXU.
        return jnp.dot(a.astype(matmul_dtype), b.astype(matmul_dtype),
                       preferred_element_type=jnp.float32)

    # All-head projections: one MXU pass each (N = n_head*d_k / n_head*d_v).
    # 1/temperature folded into the Q projection output.
    qh_all = mm(q, wq_ref[...]) * jnp.float32(inv_temperature)   # (tq, H*d_k)
    kh_all = mm(k, wk_ref[...])                                  # (len_k, H*d_k)
    vh_all = mm(v, wv_ref[...])                                  # (len_k, H*d_v)

    # int8 mask -> boolean once, reused across heads (exact masked_fill).
    masked = mask_ref[0].astype(jnp.float32) != 0.0              # (tq, len_k)

    head_outs = []
    for h in range(n_head):                       # static unroll over heads
        qh = qh_all[:, h * d_k:(h + 1) * d_k]     # (tq, d_k)
        kh = kh_all[:, h * d_k:(h + 1) * d_k]     # (len_k, d_k)
        vh = vh_all[:, h * d_v:(h + 1) * d_v]     # (len_k, d_v)

        # scores = qh @ kh^T, contracting last dims (no XLU transpose).
        scores = jax.lax.dot_general(
            qh.astype(matmul_dtype), kh.astype(matmul_dtype),
            dimension_numbers=(((1,), (1,)), ((), ())),
            preferred_element_type=jnp.float32)                  # (tq, len_k)
        scores = jnp.where(masked, neg_inf, scores)

        # softmax over the key axis (f32 math).
        scores = scores - jnp.max(scores, axis=-1, keepdims=True)
        p = jnp.exp(scores)
        attn = p * pl.reciprocal(jnp.sum(p, axis=-1, keepdims=True),
                                 approx=False)
        if attn_ref is not None:
            attn_ref[h, 0] = attn.astype(attn_ref.dtype)

        head_outs.append(mm(attn, vh))                           # (tq, d_v)

    # concat_h(head_out) @ W_fc : ONE matmul with K = n_head*d_v.
    concat = jnp.concatenate(head_outs, axis=-1)                 # (tq, H*d_v)
    y = mm(concat, fcw_ref[...]) + fcb_ref[...] + q              # bias+residual

    # LayerNorm epilogue (f32).
    mean = jnp.mean(y, axis=-1, keepdims=True)
    var = jnp.mean(jnp.square(y - mean), axis=-1, keepdims=True)
    yn = (y - mean) * jax.lax.rsqrt(var + jnp.float32(eps))
    out_ref[0] = (yn * g_ref[...] + beta_ref[...]).astype(out_ref.dtype)


def _make_mha_kernel(*, store_attn, **cfg):
    body = functools.partial(_mha_body, **cfg)
    if store_attn:
        def kernel(q_ref, k_ref, v_ref, wq_ref, wk_ref, wv_ref, fcw_ref,
                   fcb_ref, g_ref, beta_ref, mask_ref, out_ref, attn_ref):
            body(q_ref, k_ref, v_ref, wq_ref, wk_ref, wv_ref, fcw_ref,
                 fcb_ref, g_ref, beta_ref, mask_ref, out_ref, attn_ref)
    else:
        def kernel(q_ref, k_ref, v_ref, wq_ref, wk_ref, wv_ref, fcw_ref,
                   fcb_ref, g_ref, beta_ref, mask_ref, out_ref):
            body(q_ref, k_ref, v_ref, wq_ref, wk_ref, wv_ref, fcw_ref,
                 fcb_ref, g_ref, beta_ref, mask_ref, out_ref, None)
    return kernel


def _pick_q_tile(len_q):
    if len_q <= 256:
        return len_q
    for t in (256, 128, 64, 32):   # multiples of 32: safe for f32/bf16/i8 blocks
        if len_q % t == 0:
            return t
    return len_q


# ---------------------------------------------------------------------------
# Wrapper
# ---------------------------------------------------------------------------
def multi_head_attention(q, k, v, mask, params, *, n_head, d_k, d_v,
                         return_attn=True,
                         matmul_dtype=jnp.float32,   # bf16 for MXU-rate win
                         attn_dtype=jnp.float32):    # bf16 to halve attn HBM
    sz_b, len_q, d_model = q.shape
    _, len_k, _ = k.shape

    inv_temperature = float(1.0 / np.power(d_k, 0.5))
    tq = _pick_q_tile(len_q)
    n_q_tiles = len_q // tq
    assert tq * n_q_tiles == len_q

    mask_i8 = mask.astype(jnp.int8)   # 4x less mask DMA than int32

    kernel = _make_mha_kernel(
        store_attn=return_attn,
        inv_temperature=inv_temperature, eps=1e-5,
        n_head=n_head, d_k=d_k, d_v=d_v, matmul_dtype=matmul_dtype)

    in_specs = [
        pl.BlockSpec((1, tq, d_model), lambda b, qi: (b, qi, 0)),        # q
        pl.BlockSpec((1, len_k, d_model), lambda b, qi: (b, 0, 0)),      # k
        pl.BlockSpec((1, len_k, d_model), lambda b, qi: (b, 0, 0)),      # v
        pl.BlockSpec((d_model, n_head * d_k), lambda b, qi: (0, 0)),     # Wq_all
        pl.BlockSpec((d_model, n_head * d_k), lambda b, qi: (0, 0)),     # Wk_all
        pl.BlockSpec((d_model, n_head * d_v), lambda b, qi: (0, 0)),     # Wv_all
        pl.BlockSpec((n_head * d_v, d_model), lambda b, qi: (0, 0)),     # W_fc
        pl.BlockSpec((1, d_model), lambda b, qi: (0, 0)),                # fc bias
        pl.BlockSpec((1, d_model), lambda b, qi: (0, 0)),                # ln gamma
        pl.BlockSpec((1, d_model), lambda b, qi: (0, 0)),                # ln beta
        pl.BlockSpec((1, tq, len_k), lambda b, qi: (b, qi, 0)),          # mask (i8)
    ]
    out_shapes = [jax.ShapeDtypeStruct((sz_b, len_q, d_model), jnp.float32)]
    out_specs = [pl.BlockSpec((1, tq, d_model), lambda b, qi: (b, qi, 0))]
    if return_attn:
        out_shapes.append(
            jax.ShapeDtypeStruct((n_head, sz_b, len_q, len_k), attn_dtype))
        out_specs.append(
            pl.BlockSpec((n_head, 1, tq, len_k), lambda b, qi: (0, b, qi, 0)))

    # VMEM budget: double-buffered blocks + compiler-managed intermediates
    # (all-head projections, per-head scores/p/attn, concat, LN temps),
    # capped conservatively below v7x's 64 MiB physical VMEM.
    itemsize = 4
    block_elems = (
        tq * d_model + 2 * len_k * d_model                      # q, k, v blocks
        + d_model * n_head * (2 * d_k + d_v)                    # Wq/Wk/Wv
        + n_head * d_v * d_model + 3 * d_model                  # fc_w, fc_b, ln
        + tq * d_model                                          # out block
        + (n_head * tq * len_k if return_attn else 0)           # attn block
    )
    mask_bytes = tq * len_k                                     # int8
    interm_elems = (
        tq * n_head * (d_k + d_v) + len_k * n_head * (d_k + d_v)
        + 4 * tq * len_k + tq * n_head * d_v + 3 * tq * d_model
    )
    vmem_bytes = 2 * (block_elems * itemsize + mask_bytes) + interm_elems * itemsize
    vmem_limit = int(min(40 * 1024 * 1024,
                         max(4 * 1024 * 1024, 2 * vmem_bytes)))

    results = pl.pallas_call(
        kernel,
        out_shape=tuple(out_shapes),
        grid_spec=pltpu.PrefetchScalarGridSpec(
            num_scalar_prefetch=0,
            grid=(sz_b, n_q_tiles),
            in_specs=in_specs,
            out_specs=out_specs,
        ),
        compiler_params=pltpu.CompilerParams(
            dimension_semantics=("parallel", "parallel"),
            vmem_limit_bytes=vmem_limit),
    )(q, k, v,
      params["wq"], params["wk"], params["wv"],
      params["fc_w"], params["fc_b"], params["ln_g"], params["ln_b"],
      mask_i8)

    if return_attn:
        out, attn = results
        # torch returns attn with batch dim n_head*sz_b (head-major grouping).
        return out, attn.reshape(n_head * sz_b, len_q, len_k)
    (out,) = results
    return out, None


# ---------------------------------------------------------------------------
# Pure-JAX reference (mirrors the torch forward) for validation.
# ---------------------------------------------------------------------------
def reference(q, k, v, mask, params, *, n_head, d_k, d_v):
    sz_b, len_q, d_model = q.shape
    _, len_k, _ = k.shape
    temperature = np.power(d_k, 0.5)

    def split_heads(x, w, dh):
        y = (x @ w).reshape(sz_b, -1, n_head, dh)
        return jnp.transpose(y, (2, 0, 1, 3)).reshape(n_head * sz_b, -1, dh)

    qh = split_heads(q, params["wq"], d_k)
    kh = split_heads(k, params["wk"], d_k)
    vh = split_heads(v, params["wv"], d_v)

    mask_rep = jnp.tile(mask, (n_head, 1, 1))
    attn = jnp.einsum("bqd,bkd->bqk", qh, kh) / temperature
    attn = jnp.where(mask_rep != 0, -1e10, attn)
    attn = jax.nn.softmax(attn, axis=2)
    out = jnp.einsum("bqk,bkd->bqd", attn, vh)

    out = out.reshape(n_head, sz_b, len_q, d_v)
    out = jnp.transpose(out, (1, 2, 0, 3)).reshape(sz_b, len_q, n_head * d_v)
    out = out @ params["fc_w"] + params["fc_b"][0]
    out = out + q
    mean = jnp.mean(out, axis=-1, keepdims=True)
    var = jnp.mean(jnp.square(out - mean), axis=-1, keepdims=True)
    out = (out - mean) / jnp.sqrt(var + 1e-5)
    out = out * params["ln_g"][0] + params["ln_b"][0]
    return out, attn


if __name__ == "__main__":
    # Small, module-consistent shapes.
    n_head, d_model, d_k, d_v = 2, 32, 16, 16
    sz_b, len_q = 2, 8
    len_k = len_v = len_q

    key = jax.random.PRNGKey(0)
    ks = jax.random.split(key, 8)

    # Activations.
    q = jax.random.normal(ks[0], (sz_b, len_q, d_model), jnp.float32)
    k = jax.random.normal(ks[1], (sz_b, len_k, d_model), jnp.float32)
    v = jax.random.normal(ks[2], (sz_b, len_v, d_model), jnp.float32)
    # Boolean attention mask (True == masked).
    mask = (jax.random.uniform(ks[3], (sz_b, len_q, len_k)) < 0.3).astype(jnp.int32)

    # Parameters (torch init distributions), stored in the fused layouts:
    #   wq/wk/wv: (d_model, n_head*dh)  == torch Linear weight transposed
    #   fc_w    : (n_head*d_v, d_model) == torch fc weight transposed
    std_qk = np.sqrt(2.0 / (d_model + d_k))
    std_v = np.sqrt(2.0 / (d_model + d_v))
    fc_std = np.sqrt(2.0 / (n_head * d_v + d_model))   # xavier_normal_

    params = {
        "wq": std_qk * jax.random.normal(ks[4], (d_model, n_head * d_k), jnp.float32),
        "wk": std_qk * jax.random.normal(ks[5], (d_model, n_head * d_k), jnp.float32),
        "wv": std_v * jax.random.normal(ks[6], (d_model, n_head * d_v), jnp.float32),
        "fc_w": fc_std * jax.random.normal(ks[7], (n_head * d_v, d_model), jnp.float32),
        "fc_b": jnp.zeros((1, d_model), jnp.float32),
        "ln_g": jnp.ones((1, d_model), jnp.float32),
        "ln_b": jnp.zeros((1, d_model), jnp.float32),
    }

    # Full path (returns attention probabilities, f32, like the torch module).
    out, attn = multi_head_attention(q, k, v, mask, params,
                                     n_head=n_head, d_k=d_k, d_v=d_v)
    jax.block_until_ready((out, attn))

    out_ref, attn_ref = reference(q, k, v, mask, params,
                                  n_head=n_head, d_k=d_k, d_v=d_v)
    np.testing.assert_allclose(np.asarray(out), np.asarray(out_ref),
                               rtol=1e-4, atol=1e-4)
    np.testing.assert_allclose(np.asarray(attn), np.asarray(attn_ref),
                               rtol=1e-4, atol=1e-5)

    # Bandwidth-optimized variant: no attention-probability HBM write.
    out_noattn, _ = multi_head_attention(q, k, v, mask, params,
                                         n_head=n_head, d_k=d_k, d_v=d_v,
                                         return_attn=False)
    jax.block_until_ready(out_noattn)
    np.testing.assert_allclose(np.asarray(out_noattn), np.asarray(out_ref),
                               rtol=1e-4, atol=1e-4)

    print("KERNEL_OK")
</pallas_src>

<mosaic_0001>
module attributes {stable_mosaic.version = 11 : i64} {
  func.func @kernel(%arg0: i32, %arg1: i32, %arg2: memref<1x8x32xf32, #tpu.memory_space<vmem>>, %arg3: memref<1x8x32xf32, #tpu.memory_space<vmem>>, %arg4: memref<1x8x32xf32, #tpu.memory_space<vmem>>, %arg5: memref<32x32xf32, #tpu.memory_space<vmem>>, %arg6: memref<32x32xf32, #tpu.memory_space<vmem>>, %arg7: memref<32x32xf32, #tpu.memory_space<vmem>>, %arg8: memref<32x32xf32, #tpu.memory_space<vmem>>, %arg9: memref<1x32xf32, #tpu.memory_space<vmem>>, %arg10: memref<1x32xf32, #tpu.memory_space<vmem>>, %arg11: memref<1x32xf32, #tpu.memory_space<vmem>>, %arg12: memref<1x8x8xi8, #tpu.memory_space<vmem>>, %arg13: memref<1x8x32xf32, #tpu.memory_space<vmem>>, %arg14: memref<2x1x8x8xf32, #tpu.memory_space<vmem>>) attributes {dimension_semantics = [#tpu.dimension_semantics<parallel>, #tpu.dimension_semantics<parallel>], iteration_bounds = array<i64: 2, 1>, scalar_prefetch = 0 : i64, scratch_operands = 0 : i64, tpu.core_type = #tpu.core_type<tc>, window_params = [{transform_indices = @transform_0, window_bounds = array<i64: 1, 8, 32>}, {transform_indices = @transform_1, window_bounds = array<i64: 1, 8, 32>}, {transform_indices = @transform_2, window_bounds = array<i64: 1, 8, 32>}, {pipeline_mode = #tpu.pipeline_mode<synchronous>, transform_indices = @transform_3, window_bounds = array<i64: 32, 32>}, {pipeline_mode = #tpu.pipeline_mode<synchronous>, transform_indices = @transform_4, window_bounds = array<i64: 32, 32>}, {pipeline_mode = #tpu.pipeline_mode<synchronous>, transform_indices = @transform_5, window_bounds = array<i64: 32, 32>}, {pipeline_mode = #tpu.pipeline_mode<synchronous>, transform_indices = @transform_6, window_bounds = array<i64: 32, 32>}, {pipeline_mode = #tpu.pipeline_mode<synchronous>, transform_indices = @transform_7, window_bounds = array<i64: 1, 32>}, {pipeline_mode = #tpu.pipeline_mode<synchronous>, transform_indices = @transform_8, window_bounds = array<i64: 1, 32>}, {pipeline_mode = #tpu.pipeline_mode<synchronous>, transform_indices = @transform_9, window_bounds = array<i64: 1, 32>}, {transform_indices = @transform_10, window_bounds = array<i64: 1, 8, 8>}, {transform_indices = @transform_11, window_bounds = array<i64: 1, 8, 32>}, {transform_indices = @transform_12, window_bounds = array<i64: 2, 1, 8, 8>}]} {
    %c0 = arith.constant 0 : index
    %c0_0 = arith.constant 0 : index
    %c0_1 = arith.constant 0 : index
    %0 = vector.load %arg2[%c0, %c0_0, %c0_1] : memref<1x8x32xf32, #tpu.memory_space<vmem>>, vector<1x8x32xf32>
    %1 = vector.shape_cast %0 : vector<1x8x32xf32> to vector<8x32xf32>
    %c0_2 = arith.constant 0 : index
    %c0_3 = arith.constant 0 : index
    %c0_4 = arith.constant 0 : index
    %2 = vector.load %arg3[%c0_2, %c0_3, %c0_4] : memref<1x8x32xf32, #tpu.memory_space<vmem>>, vector<1x8x32xf32>
    %3 = vector.shape_cast %2 : vector<1x8x32xf32> to vector<8x32xf32>
    %c0_5 = arith.constant 0 : index
    %c0_6 = arith.constant 0 : index
    %c0_7 = arith.constant 0 : index
    %4 = vector.load %arg4[%c0_5, %c0_6, %c0_7] : memref<1x8x32xf32, #tpu.memory_space<vmem>>, vector<1x8x32xf32>
    %5 = vector.shape_cast %4 : vector<1x8x32xf32> to vector<8x32xf32>
    %c0_8 = arith.constant 0 : index
    %c0_9 = arith.constant 0 : index
    %6 = vector.load %arg5[%c0_8, %c0_9] : memref<32x32xf32, #tpu.memory_space<vmem>>, vector<32x32xf32>
    %cst = arith.constant dense<0.000000e+00> : vector<8x32xf32>
    %7 = tpu.matmul %1, %6, %cst {dimension_numbers = #tpu.dot_dimension_numbers<[1], [0], [0], [1], [0, 0, 1, 1], [], []>} : vector<8x32xf32>, vector<32x32xf32>, vector<8x32xf32> -> vector<8x32xf32>
    %cst_10 = arith.constant 2.500000e-01 : f32
    %8 = vector.broadcast %cst_10 : f32 to vector<8x32xf32>
    %9 = arith.mulf %7, %8 : vector<8x32xf32>
    %c0_11 = arith.constant 0 : index
    %c0_12 = arith.constant 0 : index
    %10 = vector.load %arg6[%c0_11, %c0_12] : memref<32x32xf32, #tpu.memory_space<vmem>>, vector<32x32xf32>
    %cst_13 = arith.constant dense<0.000000e+00> : vector<8x32xf32>
    %11 = tpu.matmul %3, %10, %cst_13 {dimension_numbers = #tpu.dot_dimension_numbers<[1], [0], [0], [1], [0, 0, 1, 1], [], []>} : vector<8x32xf32>, vector<32x32xf32>, vector<8x32xf32> -> vector<8x32xf32>
    %c0_14 = arith.constant 0 : index
    %c0_15 = arith.constant 0 : index
    %12 = vector.load %arg7[%c0_14, %c0_15] : memref<32x32xf32, #tpu.memory_space<vmem>>, vector<32x32xf32>
    %cst_16 = arith.constant dense<0.000000e+00> : vector<8x32xf32>
    %13 = tpu.matmul %5, %12, %cst_16 {dimension_numbers = #tpu.dot_dimension_numbers<[1], [0], [0], [1], [0, 0, 1, 1], [], []>} : vector<8x32xf32>, vector<32x32xf32>, vector<8x32xf32> -> vector<8x32xf32>
    %c0_17 = arith.constant 0 : index
    %c0_18 = arith.constant 0 : index
    %c0_19 = arith.constant 0 : index
    %14 = vector.load %arg12[%c0_17, %c0_18, %c0_19] : memref<1x8x8xi8, #tpu.memory_space<vmem>>, vector<1x8x8xi8>
    %15 = vector.shape_cast %14 : vector<1x8x8xi8> to vector<8x8xi8>
    %16 = arith.sitofp %15 : vector<8x8xi8> to vector<8x8xf32>
    %cst_20 = arith.constant 0.000000e+00 : f32
    %17 = vector.broadcast %cst_20 : f32 to vector<8x8xf32>
    %18 = arith.cmpf one, %16, %17 : vector<8x8xf32>
    %19 = vector.extract_strided_slice %9 {offsets = [0, 0], sizes = [8, 16], strides = [1, 1]} : vector<8x32xf32> to vector<8x16xf32>
    %20 = vector.extract_strided_slice %11 {offsets = [0, 0], sizes = [8, 16], strides = [1, 1]} : vector<8x32xf32> to vector<8x16xf32>
    %21 = vector.extract_strided_slice %13 {offsets = [0, 0], sizes = [8, 16], strides = [1, 1]} : vector<8x32xf32> to vector<8x16xf32>
    %cst_21 = arith.constant dense<0.000000e+00> : vector<8x8xf32>
    %22 = tpu.matmul %19, %20, %cst_21 {dimension_numbers = #tpu.dot_dimension_numbers<[1], [1], [0], [0], [0, 0, 1, 0], [], []>} : vector<8x16xf32>, vector<8x16xf32>, vector<8x8xf32> -> vector<8x8xf32>
    %cst_22 = arith.constant -1.000000e+10 : f32
    %23 = vector.broadcast %cst_22 : f32 to vector<8x8xf32>
    %24 = arith.select %18, %23, %22 : vector<8x8xi1>, vector<8x8xf32>
    %cst_23 = arith.constant dense<0xFF800000> : vector<8xf32>
    %25 = vector.multi_reduction <maximumf>, %24, %cst_23 [1] : vector<8x8xf32> to vector<8xf32>
    %26 = vector.shape_cast %25 : vector<8xf32> to vector<8x1xf32>
    %27 = vector.broadcast %26 : vector<8x1xf32> to vector<8x8xf32>
    %28 = arith.subf %24, %27 : vector<8x8xf32>
    %29 = math.exp %28 : vector<8x8xf32>
    %cst_24 = arith.constant dense<0.000000e+00> : vector<8xf32>
    %30 = vector.multi_reduction <add>, %29, %cst_24 [1] : vector<8x8xf32> to vector<8xf32>
    %31 = vector.shape_cast %30 : vector<8xf32> to vector<8x1xf32>
    %32 = tpu.reciprocal %31 : vector<8x1xf32> -> vector<8x1xf32>
    %33 = vector.broadcast %32 : vector<8x1xf32> to vector<8x8xf32>
    %34 = arith.mulf %29, %33 : vector<8x8xf32>
    %c0_25 = arith.constant 0 : index
    %c0_26 = arith.constant 0 : index
    %c0_27 = arith.constant 0 : index
    %c0_28 = arith.constant 0 : index
    %35 = vector.load %arg14[%c0_25, %c0_26, %c0_27, %c0_28] : memref<2x1x8x8xf32, #tpu.memory_space<vmem>>, vector<1x1x8x8xf32>
    %36 = vector.shape_cast %35 : vector<1x1x8x8xf32> to vector<8x8xf32>
    %37 = vector.shape_cast %34 : vector<8x8xf32> to vector<1x1x8x8xf32>
    tpu.vector_store %arg14[%c0_25, %c0_26, %c0_27, %c0_28], %37 {strides = array<i32>} : memref<2x1x8x8xf32, #tpu.memory_space<vmem>>, vector<1x1x8x8xf32>,
    %cst_29 = arith.constant dense<0.000000e+00> : vector<8x16xf32>
    %38 = tpu.matmul %34, %21, %cst_29 {dimension_numbers = #tpu.dot_dimension_numbers<[1], [0], [0], [1], [0, 0, 1, 1], [], []>} : vector<8x8xf32>, vector<8x16xf32>, vector<8x16xf32> -> vector<8x16xf32>
    %39 = vector.extract_strided_slice %9 {offsets = [0, 16], sizes = [8, 16], strides = [1, 1]} : vector<8x32xf32> to vector<8x16xf32>
    %40 = vector.extract_strided_slice %11 {offsets = [0, 16], sizes = [8, 16], strides = [1, 1]} : vector<8x32xf32> to vector<8x16xf32>
    %41 = vector.extract_strided_slice %13 {offsets = [0, 16], sizes = [8, 16], strides = [1, 1]} : vector<8x32xf32> to vector<8x16xf32>
    %cst_30 = arith.constant dense<0.000000e+00> : vector<8x8xf32>
    %42 = tpu.matmul %39, %40, %cst_30 {dimension_numbers = #tpu.dot_dimension_numbers<[1], [1], [0], [0], [0, 0, 1, 0], [], []>} : vector<8x16xf32>, vector<8x16xf32>, vector<8x8xf32> -> vector<8x8xf32>
    %cst_31 = arith.constant -1.000000e+10 : f32
    %43 = vector.broadcast %cst_31 : f32 to vector<8x8xf32>
    %44 = arith.select %18, %43, %42 : vector<8x8xi1>, vector<8x8xf32>
    %cst_32 = arith.constant dense<0xFF800000> : vector<8xf32>
    %45 = vector.multi_reduction <maximumf>, %44, %cst_32 [1] : vector<8x8xf32> to vector<8xf32>
    %46 = vector.shape_cast %45 : vector<8xf32> to vector<8x1xf32>
    %47 = vector.broadcast %46 : vector<8x1xf32> to vector<8x8xf32>
    %48 = arith.subf %44, %47 : vector<8x8xf32>
    %49 = math.exp %48 : vector<8x8xf32>
    %cst_33 = arith.constant dense<0.000000e+00> : vector<8xf32>
    %50 = vector.multi_reduction <add>, %49, %cst_33 [1] : vector<8x8xf32> to vector<8xf32>
    %51 = vector.shape_cast %50 : vector<8xf32> to vector<8x1xf32>
    %52 = tpu.reciprocal %51 : vector<8x1xf32> -> vector<8x1xf32>
    %53 = vector.broadcast %52 : vector<8x1xf32> to vector<8x8xf32>
    %54 = arith.mulf %49, %53 : vector<8x8xf32>
    %c1 = arith.constant 1 : index
    %c0_34 = arith.constant 0 : index
    %c0_35 = arith.constant 0 : index
    %c0_36 = arith.constant 0 : index
    %55 = vector.load %arg14[%c1, %c0_34, %c0_35, %c0_36] : memref<2x1x8x8xf32, #tpu.memory_space<vmem>>, vector<1x1x8x8xf32>
    %56 = vector.shape_cast %55 : vector<1x1x8x8xf32> to vector<8x8xf32>
    %57 = vector.shape_cast %54 : vector<8x8xf32> to vector<1x1x8x8xf32>
    tpu.vector_store %arg14[%c1, %c0_34, %c0_35, %c0_36], %57 {strides = array<i32>} : memref<2x1x8x8xf32, #tpu.memory_space<vmem>>, vector<1x1x8x8xf32>,
    %cst_37 = arith.constant dense<0.000000e+00> : vector<8x16xf32>
    %58 = tpu.matmul %54, %41, %cst_37 {dimension_numbers = #tpu.dot_dimension_numbers<[1], [0], [0], [1], [0, 0, 1, 1], [], []>} : vector<8x8xf32>, vector<8x16xf32>, vector<8x16xf32> -> vector<8x16xf32>
    %59 = tpu.concatenate %38, %58 in 1 : vector<8x16xf32>, vector<8x16xf32> -> vector<8x32xf32>
    %c0_38 = arith.constant 0 : index
    %c0_39 = arith.constant 0 : index
    %60 = vector.load %arg8[%c0_38, %c0_39] : memref<32x32xf32, #tpu.memory_space<vmem>>, vector<32x32xf32>
    %cst_40 = arith.constant dense<0.000000e+00> : vector<8x32xf32>
    %61 = tpu.matmul %59, %60, %cst_40 {dimension_numbers = #tpu.dot_dimension_numbers<[1], [0], [0], [1], [0, 0, 1, 1], [], []>} : vector<8x32xf32>, vector<32x32xf32>, vector<8x32xf32> -> vector<8x32xf32>
    %c0_41 = arith.constant 0 : index
    %c0_42 = arith.constant 0 : index
    %62 = vector.load %arg9[%c0_41, %c0_42] : memref<1x32xf32, #tpu.memory_space<vmem>>, vector<1x32xf32>
    %63 = vector.broadcast %62 : vector<1x32xf32> to vector<8x32xf32>
    %64 = arith.addf %61, %63 : vector<8x32xf32>
    %65 = arith.addf %64, %1 : vector<8x32xf32>
    %cst_43 = arith.constant dense<0.000000e+00> : vector<8xf32>
    %66 = vector.multi_reduction <add>, %65, %cst_43 [1] : vector<8x32xf32> to vector<8xf32>
    %67 = vector.shape_cast %66 : vector<8xf32> to vector<8x1xf32>
    %cst_44 = arith.constant 3.200000e+01 : f32
    %68 = vector.broadcast %cst_44 : f32 to vector<8x1xf32>
    %69 = arith.divf %67, %68 : vector<8x1xf32>
    %70 = vector.broadcast %69 : vector<8x1xf32> to vector<8x32xf32>
    %71 = arith.subf %65, %70 : vector<8x32xf32>
    %72 = arith.mulf %71, %71 : vector<8x32xf32>
    %cst_45 = arith.constant dense<0.000000e+00> : vector<8xf32>
    %73 = vector.multi_reduction <add>, %72, %cst_45 [1] : vector<8x32xf32> to vector<8xf32>
    %74 = vector.shape_cast %73 : vector<8xf32> to vector<8x1xf32>
    %cst_46 = arith.constant 3.200000e+01 : f32
    %75 = vector.broadcast %cst_46 : f32 to vector<8x1xf32>
    %76 = arith.divf %74, %75 : vector<8x1xf32>
    %77 = vector.broadcast %69 : vector<8x1xf32> to vector<8x32xf32>
    %78 = arith.subf %65, %77 : vector<8x32xf32>
    %cst_47 = arith.constant 9.99999974E-6 : f32
    %79 = vector.broadcast %cst_47 : f32 to vector<8x1xf32>
    %80 = arith.addf %76, %79 : vector<8x1xf32>
    %81 = math.rsqrt %80 : vector<8x1xf32>
    %82 = vector.broadcast %81 : vector<8x1xf32> to vector<8x32xf32>
    %83 = arith.mulf %78, %82 : vector<8x32xf32>
    %c0_48 = arith.constant 0 : index
    %c0_49 = arith.constant 0 : index
    %84 = vector.load %arg10[%c0_48, %c0_49] : memref<1x32xf32, #tpu.memory_space<vmem>>, vector<1x32xf32>
    %85 = vector.broadcast %84 : vector<1x32xf32> to vector<8x32xf32>
    %86 = arith.mulf %83, %85 : vector<8x32xf32>
    %c0_50 = arith.constant 0 : index
    %c0_51 = arith.constant 0 : index
    %87 = vector.load %arg11[%c0_50, %c0_51] : memref<1x32xf32, #tpu.memory_space<vmem>>, vector<1x32xf32>
    %88 = vector.broadcast %87 : vector<1x32xf32> to vector<8x32xf32>
    %89 = arith.addf %86, %88 : vector<8x32xf32>
    %c0_52 = arith.constant 0 : index
    %c0_53 = arith.constant 0 : index
    %c0_54 = arith.constant 0 : index
    %90 = vector.load %arg13[%c0_52, %c0_53, %c0_54] : memref<1x8x32xf32, #tpu.memory_space<vmem>>, vector<1x8x32xf32>
    %91 = vector.shape_cast %90 : vector<1x8x32xf32> to vector<8x32xf32>
    %92 = vector.shape_cast %89 : vector<8x32xf32> to vector<1x8x32xf32>
    tpu.vector_store %arg13[%c0_52, %c0_53, %c0_54], %92 {strides = array<i32>} : memref<1x8x32xf32, #tpu.memory_space<vmem>>, vector<1x8x32xf32>,
    return
  }
  func.func @transform_0(%arg0: i32, %arg1: i32) -> (i32, i32, i32) {
    %c0_i32 = arith.constant 0 : i32
    %c0_i32_0 = arith.constant 0 : i32
    return %arg0, %arg1, %c0_i32 : i32, i32, i32
  }
  func.func @transform_1(%arg0: i32, %arg1: i32) -> (i32, i32, i32) {
    %c0_i32 = arith.constant 0 : i32
    %c0_i32_0 = arith.constant 0 : i32
    %c0_i32_1 = arith.constant 0 : i32
    return %arg0, %c0_i32, %c0_i32_0 : i32, i32, i32
  }
  func.func @transform_2(%arg0: i32, %arg1: i32) -> (i32, i32, i32) {
    %c0_i32 = arith.constant 0 : i32
    %c0_i32_0 = arith.constant 0 : i32
    %c0_i32_1 = arith.constant 0 : i32
    return %arg0, %c0_i32, %c0_i32_0 : i32, i32, i32
  }
  func.func @transform_3(%arg0: i32, %arg1: i32) -> (i32, i32) {
    %c0_i32 = arith.constant 0 : i32
    %c0_i32_0 = arith.constant 0 : i32
    %c0_i32_1 = arith.constant 0 : i32
    return %c0_i32, %c0_i32_0 : i32, i32
  }
  func.func @transform_4(%arg0: i32, %arg1: i32) -> (i32, i32) {
    %c0_i32 = arith.constant 0 : i32
    %c0_i32_0 = arith.constant 0 : i32
    %c0_i32_1 = arith.constant 0 : i32
    return %c0_i32, %c0_i32_0 : i32, i32
  }
  func.func @transform_5(%arg0: i32, %arg1: i32) -> (i32, i32) {
    %c0_i32 = arith.constant 0 : i32
    %c0_i32_0 = arith.constant 0 : i32
    %c0_i32_1 = arith.constant 0 : i32
    return %c0_i32, %c0_i32_0 : i32, i32
  }
  func.func @transform_6(%arg0: i32, %arg1: i32) -> (i32, i32) {
    %c0_i32 = arith.constant 0 : i32
    %c0_i32_0 = arith.constant 0 : i32
    %c0_i32_1 = arith.constant 0 : i32
    return %c0_i32, %c0_i32_0 : i32, i32
  }
  func.func @transform_7(%arg0: i32, %arg1: i32) -> (i32, i32) {
    %c0_i32 = arith.constant 0 : i32
    %c0_i32_0 = arith.constant 0 : i32
    %c0_i32_1 = arith.constant 0 : i32
    return %c0_i32, %c0_i32_0 : i32, i32
  }
  func.func @transform_8(%arg0: i32, %arg1: i32) -> (i32, i32) {
    %c0_i32 = arith.constant 0 : i32
    %c0_i32_0 = arith.constant 0 : i32
    %c0_i32_1 = arith.constant 0 : i32
    return %c0_i32, %c0_i32_0 : i32, i32
  }
  func.func @transform_9(%arg0: i32, %arg1: i32) -> (i32, i32) {
    %c0_i32 = arith.constant 0 : i32
    %c0_i32_0 = arith.constant 0 : i32
    %c0_i32_1 = arith.constant 0 : i32
    return %c0_i32, %c0_i32_0 : i32, i32
  }
  func.func @transform_10(%arg0: i32, %arg1: i32) -> (i32, i32, i32) {
    %c0_i32 = arith.constant 0 : i32
    %c0_i32_0 = arith.constant 0 : i32
    return %arg0, %arg1, %c0_i32 : i32, i32, i32
  }
  func.func @transform_11(%arg0: i32, %arg1: i32) -> (i32, i32, i32) {
    %c0_i32 = arith.constant 0 : i32
    %c0_i32_0 = arith.constant 0 : i32
    return %arg0, %arg1, %c0_i32 : i32, i32, i32
  }
  func.func @transform_12(%arg0: i32, %arg1: i32) -> (i32, i32, i32, i32) {
    %c0_i32 = arith.constant 0 : i32
    %c0_i32_0 = arith.constant 0 : i32
    %c0_i32_1 = arith.constant 0 : i32
    return %c0_i32, %arg0, %arg1, %c0_i32_0 : i32, i32, i32, i32
  }
}

</mosaic_0001>

<bundles_post_ra>
// kernel: tpu_custom_call.1
= control target key start
LH: loop header
LB: loop body
LE: loop exit
PB: predicated region body
PF: predicated region fallthrough
CT: control target
= control target key end

     0   :  { %s2092_s0 = inlined_call_operand.hbm [shape: f32[2,8,32], index: 0, kind: input, shape index: {}]   ;;  %s2093_s1 = inlined_call_operand.hbm [shape: f32[2,8,32], index: 1, kind: input, shape index: {}]   ;;  %s2094_s2 = inlined_call_operand.hbm [shape: f32[2,8,32], index: 2, kind: input, shape index: {}]   ;;  %s2095_s3 = inlined_call_operand.hbm [shape: f32[32,32], index: 3, kind: input, shape index: {}]   ;;  %s2096_s4 = inlined_call_operand.hbm [shape: f32[32,32], index: 4, kind: input, shape index: {}]   ;;  %s2097_s5 = inlined_call_operand.hbm [shape: f32[32,32], index: 5, kind: input, shape index: {}]   ;;  %s2098_s6 = inlined_call_operand.hbm [shape: f32[32,32], index: 6, kind: input, shape index: {}]   ;;  %s2099_s7 = inlined_call_operand.vmem [shape: f32[1,32], index: 7, kind: input, shape index: {}]   ;;  %s2100_s8 = inlined_call_operand.vmem [shape: f32[1,32], index: 8, kind: input, shape index: {}]   ;;  %s2101_s9 = inlined_call_operand.vmem [shape: f32[1,32], index: 9, kind: input, shape index: {}]   ;;  %s2102_s10 = inlined_call_operand.vmem [shape: s8[2,8,8], index: 10, kind: input, shape index: {}]   ;;  %s2103_s11 = inlined_call_operand.hbm [shape: f32[2,8,32], index: 11, kind: output, shape index: {0}]   ;;  %s2104_s12 = inlined_call_operand.hbm [shape: f32[2,2,8,8], index: 12, kind: output, shape index: {1}]  }
   0x1   :  { %2117 = sst [smem:[#allocation29_spill]] %s2092_s0 }
   0x2   :  { %2118 = sst [smem:[#allocation30_spill]] %s2093_s1 }
   0x3   :  { %2119 = sst [smem:[#allocation31_spill]] %s2095_s3 }
   0x4   :  { %2120 = sst [smem:[#allocation32_spill]] %s2096_s4 }
   0x5   :  { %2121 = sst [smem:[#allocation33_spill]] %s2097_s5 }
   0x6   :  { %2122 = sst [smem:[#allocation34_spill]] %s2098_s6 }
   0x7   :  { %2123 = sst [smem:[#allocation35_spill]] %s2100_s8 }
   0x8   :  { %2124 = sst [smem:[#allocation36_spill]] %s2101_s9 }
   0x9   :  { %2125 = sst [smem:[#allocation37_spill]] %s2103_s11 }
   0xa   :  { %18 = vsyncpa [#allocation3], 0 }
   0xb   :  { %20 = vsyncpa [#allocation3 + $0x1], 0 }
   0xc   :  { %21 = vsyncpa [#allocation6], 0 }
   0xd   :  { %23 = vsyncpa [#allocation6 + $0x1], 0 }
   0xe   :  { %24 = vsyncpa [#allocation9], 0 }
   0xf   :  { %25 = vsyncpa [#allocation12], 0 }
  0x10   :  { %26 = vsyncpa [#allocation4], 0 }
  0x11   :  { %28 = vsyncpa [#allocation4 + $0x1], 0 }
  0x12   :  { %29 = vsyncpa [#allocation16], 0 }
  0x13   :  { %31 = vsyncpa [#allocation16 + $0x1], 0  ;;  %s1803_s21 = smov 0   ;;  %s1805_s22 = smov 0  }
  0x14   :  { %s1807_s23 = smov 0   ;;  %s1809_s24 = smov 0  }
  0x15   :  { %s1811_s25 = smov 0   ;;  %s1813_s26 = smov 0  }
  0x16 LB: > { %2126 = sst [smem:[#allocation23_spill]] %s1704_s21  ;;  %s1834_s27 = sadd.s32 4294967295, %s1724_s26   ;;  %s1724_s26 = sphi %s1813_s26, %s37_s26   ;;  %s1720_s25 = sphi %s1811_s25, %s2156_s25   ;;  %s1716_s24 = sphi %s1809_s24, %s2155_s24   ;;  %s1712_s23 = sphi %s1807_s23, %s2159_s23   ;;  %s1708_s22 = sphi %s1805_s22, %s2158_s22   ;;  %s1704_s21 = sphi %s1803_s21, %s2157_s21  }
  0x17   : > { %2127 = sst [smem:[#allocation24_spill]] %s1720_s25  ;;  %p1207_p0 = scmp.ge.s32.totalorder %s1724_s26, 1 }
  0x18   : > { %2128 = sst [smem:[#allocation25_spill]] %s1724_s26  ;;  %p72_p1 = scmp.eq.s32.totalorder %s1834_s27, 0 }
  0x19   : > { %p365_p2 = scmp.lt.s32.totalorder %s1724_s26, 3  ;;  %s2129_s3 = sld [smem:[#allocation31_spill]] }
  0x1a   : > { %s1726_s14 = smov [#allocation8]   ;;  %p1212_p6 = scmp.ge.s32.totalorder %s1724_s26, 2 }
  0x1b   : > { %p1842_p3 = pnand %p1207_p0, %p365_p2  ;;  %s378_s15 = sshll.u32 %s1726_s14, 4  ;;  %s379_s15 = int_to_ptr.vmem [resolvable:$true] %s378_s15 }
  0x1c   : > { %s2132_s5 = sld [smem:[#allocation33_spill]]  ;;  %s2105_s20 = smov 128  }
  0x1d   : > { %p1273_p4 = pneg %p1842_p3  ;;  %s2107_s28 = smov 8  }
  0x1e   : > { %s1729_s29 = smov [#allocation11]   ;;  %s1206_s17 = sadd.s32 4294967294, %s1724_s26  }
  0x1f   : > { %s376_s30 = sshll.u32 %s2129_s3, 4  ;;  %p1850_p5 = pnand %p1273_p4, %p72_p1  ;;  %s377_s30 = int_to_ptr.hbm [resolvable:$true] %s376_s30 }
  0x20   : > { %s406_s14 = sshll.u32 %s1729_s29, 4  ;;  %s49_s18 = sadd.s32 1, %s1720_s25  ;;  %s407_s14 = int_to_ptr.vmem [resolvable:$true] %s406_s14 }
  0x21   : > { %1276 = dma.hbm_to_vmem [thread:$0]  (!%p1850_p5), %s377_s30, 512, %s379_s15, [#allocation9], %s2105_s20, %s2105_s20, %s2107_s28  }
  0x22   : > { %s404_s19 = sshll.u32 %s2132_s5, 4  ;;  %p51_p7 = scmp.ge.s32.totalorder %s49_s18, 2  ;;  %s405_s19 = int_to_ptr.hbm [resolvable:$true] %s404_s19 }
  0x23   : > { %1282 = dma.hbm_to_vmem [thread:$0]  (!%p1850_p5), %s405_s19, 512, %s407_s14, [#allocation12], %s2105_s20, %s2105_s20, %s2107_s28  }
  0x24   : > { %s58_s3 = sadd.s32 1, %s1712_s23  ;;  %p65_p8 = scmp.ne.s32.totalorder %s1712_s23, %s1708_s22 }
  0x25   : > { %p66_p9 = scmp.eq.s32.totalorder %s1724_s26, 0  ;;  %s2161_s18 = smov (%p51_p7, %s49_s18), 0 }
  0x26   : > { %2133 = sst [smem:[#allocation26_spill]] %s2161_s18  ;;  %p71_p11 = scmp.ne.s32.totalorder %s1708_s22, %s1704_s21 }
  0x27   : > { %p1876_p10 = por %p66_p9, %p65_p8  ;;  %s53_s15 = ssub.s32 %s1720_s25, %s2161_s18 }
  0x28   : > { %p324_p12 = scmp.eq.s32.totalorder %s1834_s27, 1  ;;  %p56_p13 = scmp.eq.s32.totalorder %s53_s15, 0 }
  0x29   : > { %p1887_p0 = por %p72_p1, %p71_p11  ;;  %p330_p4 = scmp.eq.s32.totalorder %s1206_s17, 1 }
  0x2a   : > { %p1891_p2 = por %p324_p12, %p65_p8  ;;  %p1307_p9 = scmp.lt.s32.totalorder %s1724_s26, 2 }
  0x2b   : > { %s1896_s14 = scalar_select %p56_p13, %s1712_s23, %s58_s3  }
  0x2c   : > { %p1898_p7 = por %p330_p4, %p71_p11  ;;  %s2113_s28 = sand.u32 1, %s1712_s23  }
  0x2d   : > { %2137 = sst [smem:[#allocation27_spill]] %s1896_s14  ;;  %s1905_s5 = sshll.u32 %s1720_s25, 3 }
  0x2e   : > { %s2138_s20 = scalar_select %p1898_p7, 1, 0 }
  0x2f   : > { %s1909_s15 = sshll.u32 %s2113_s28, 3  ;;  %p1913_p8 = pnand %p1307_p9, %p1876_p10 }
  0x30   : > { %2139 = sst [smem:[#allocation28_spill]] %s2138_s20  ;;  %s463_s3 = sand.u32 1, %s1724_s26  }
  0x31   : > { %s2141_s1 = sld [smem:[#allocation30_spill]]  ;;  %s467_s21 = scalar_lea.vmem [#allocation5], %s1909_s15 }
  0x32   : > { %s475_s25 = sshll.u32 %s467_s21, 4  ;;  %s2142_s4 = sld [smem:[#allocation32_spill]]  ;;  %s476_s25 = int_to_ptr.vmem [resolvable:$true] %s475_s25 }
  0x33   : > { %s464_s8 = scalar_lea.sflag [#allocation6], %s463_s3  ;;  %s1730_s26 = smov [#allocation10]  }
  0x34   : > { %s392_s14 = sshll.u32 %s1730_s26, 4  ;;  %s2143_s6 = sld [smem:[#allocation34_spill]]  ;;  %s393_s14 = int_to_ptr.vmem [resolvable:$true] %s392_s14 }
  0x35   : > { %s2145_s28 = smov 128   ;;  %s1731_s3 = smov [#allocation13]  }
  0x36   : > { %s2146_s0 = sld [smem:[#allocation29_spill]]  ;;  %s447_s17 = scalar_lea.vmem [#allocation2], %s1909_s15 }
  0x37   : > { %s471_s20 = scalar_lea.hbm %s2141_s1, %s1905_s5 }
  0x38   : > { %s473_s9 = sshll.u32 %s471_s20, 4  ;;  %s390_s11 = sshll.u32 %s2142_s4, 4  ;;  %s474_s9 = int_to_ptr.hbm [resolvable:$true] %s473_s9  ;;  %s391_s11 = int_to_ptr.hbm [resolvable:$true] %s390_s11 }
  0x39   : > { %1292 = dma.hbm_to_vmem [thread:$0]  (!%p1913_p8), %s474_s9, 128, %s476_s25, %s464_s8  }
  0x3a   : > { %s418_s21 = sshll.u32 %s2143_s6, 4  ;;  %s2144_s20 = smov 8   ;;  %s419_s21 = int_to_ptr.hbm [resolvable:$true] %s418_s21 }
  0x3b   : > { %1279 = dma.hbm_to_vmem [thread:$0]  (!%p1850_p5), %s391_s11, 512, %s393_s14, [#allocation9], %s2145_s28, %s2145_s28, %s2144_s20  }
  0x3c   : > { %s420_s9 = sshll.u32 %s1731_s3, 4  ;;  %s452_s26 = scalar_lea.hbm %s2146_s0, %s1905_s5  ;;  %s421_s9 = int_to_ptr.vmem [resolvable:$true] %s420_s9 }
  0x3d   : > { %1285 = dma.hbm_to_vmem [thread:$0]  (!%p1850_p5), %s419_s21, 512, %s421_s9, [#allocation12], %s2145_s28, %s2145_s28, %s2144_s20  }
  0x3e   : > { %s454_s1 = sshll.u32 %s452_s26, 4  ;;  %s456_s4 = sshll.u32 %s447_s17, 4  ;;  %s455_s1 = int_to_ptr.hbm [resolvable:$true] %s454_s1  ;;  %s457_s4 = int_to_ptr.vmem [resolvable:$true] %s456_s4 }
  0x3f   : > { %s2147_s6 = sand.u32 1, %s1712_s23   ;;  %s490_s25 = scalar_lea.hbm %s2094_s2, %s1905_s5 }
  0x40   : > { %s444_s11 = scalar_lea.sflag [#allocation3], %s2147_s6  ;;  %s492_s30 = sshll.u32 %s490_s25, 4  ;;  %s493_s30 = int_to_ptr.hbm [resolvable:$true] %s492_s30 }
  0x41   : > { %1289 = dma.hbm_to_vmem [thread:$0]  (!%p1913_p8), %s455_s1, 128, %s457_s4, %s444_s11  }
  0x42   : > { %s486_s0 = scalar_lea.vmem [#allocation7], %s1909_s15  ;;  %513 = sbr.rel (%p1842_p3) target bundleno = 1376 (0x560), region = 64 }
  0x43   : > { %s494_s16 = sshll.u32 %s486_s0, 4  ;;  %s1960_s21 = sand.u32 (!%p1842_p3), 1, %s1708_s22   ;;  %s495_s16 = int_to_ptr.vmem [resolvable:$true] %s494_s16 }
  0x44   : > { %1295 = dma.hbm_to_vmem [thread:$0]  (!%p1913_p8), %s493_s30, 128, %s495_s16, %s464_s8  }
  0x45   : > { %s1963_s4 = sshll.u32 (!%p1842_p3), %s1960_s21, 3  ;;  %s516_s5 = scalar_lea.sflag (!%p1842_p3), [#allocation3], %s1960_s21 }
  0x46   : > { %s519_s6 = scalar_lea.vmem (!%p1842_p3), [#allocation2], %s1963_s4 }
  0x47   : > { %1679 = dma.done.wait (%p1887_p0), %s516_s5, 128  }
  0x48   : > { %1681 = vsyncadd (%p1887_p0), %s516_s5, 4294967168  ;;  %s525_s0 = sand.u32 1, %s1834_s27   ;;  %s529_s13 = scalar_lea.vmem [#allocation5], %s1963_s4 }
  0x49   : > { %s526_s8 = scalar_lea.sflag [#allocation6], %s525_s0 }
  0x4a   : > { %1683 = dma.done.wait (%p1887_p0), %s526_s8, 256  }
  0x4b   : > { %1685 = vsyncadd (%p1887_p0), %s526_s8, 4294967040  ;;  %s539_s18 = scalar_lea.vmem [#allocation7], %s1963_s4 }
  0x4c   : > { %1687 = dma.done.wait (%p72_p1), [#allocation9], 1024  }
  0x4d   : > { %1689 = vsyncadd (%p72_p1), [#allocation9], 4294966272 }
  0x4e   : > { %1691 = dma.done.wait (%p72_p1), [#allocation12], 1024  }
  0x4f   : > { %1693 = vsyncadd (%p72_p1), [#allocation12], 4294966272  ;;  %v665_v0 = vld [vmem:[#allocation10 + $0x18] sm:$0xff]  ;;  %v664_v1 = vld [vmem:[#allocation10 + $0x10] sm:$0xff]  ;;  %vm637_vm0 = vcmask 261120   ;;  %vm720_vm1 = vcmask 130048  }
  0x50   : > { %681 = vmatpush.msra.mxu1 %v665_v0  ;;  %v636_v2 = vld [vmem:[#allocation8 + $0x18] sm:$0xff]  ;;  %v663_v3 = vld [vmem:[#allocation10 + $0x8] sm:$0xff]  ;;  %v635_v4 = vld [vmem:[#allocation8 + $0x10] sm:$0xff]  ;;  %s1732_s27 = smov 112   ;;  %p623_p1 = scmp.lt.s32.totalorder %s1716_s24, 1  ;;  %vm748_vm3 = vcmask 64512  }
  0x51   : > { %653 = vmatpush.msra.mxu0 %v636_v2  ;;  %v634_v5 = vld [vmem:[#allocation8 + $0x8] sm:$0xff]  ;;  %v662_v6 = vld [vmem:[#allocation10] sm:$0xff]  ;;  %v1986_v9 = vld [vmem:[%s519_s6] sm:$0xff]  ;;  %s1228_s26 = sshll.u32 %s1960_s21, 4  ;;  %s1733_s17 = smov 16  }
  0x52   : > { %682 = vmatpush.msra.mxu1 %v664_v1  ;;  %v631_v7 = vld [vmem:[%s529_s13] sm:$0xff]  ;;  %s624_s19 = scalar_select %p623_p1, %s1716_s24, 1  ;;  %v692_v15 = vld [vmem:[#allocation11 + $0x18] sm:$0xff]  ;;  %v691_v16 = vld [vmem:[#allocation11 + $0x10] sm:$0xff] }
  0x53   : > { %654 = vmatpush.msra.mxu0 %v635_v4  ;;  %v633_v8 = vld [vmem:[#allocation8] sm:$0xff]  ;;  %708 = vmatpush.msra.mxu2 %v692_v15  ;;  %v690_v17 = vld [vmem:[#allocation11 + $0x8] sm:$0xff]  ;;  %v632_v19 = vld [vmem:[%s539_s18] sm:$0xff]  ;;  %s2011_s1 = scalar_lea.vmem [#allocation15], %s1228_s26  ;;  %v1734_v15 = vmov 32.0   ;;  %s1243_s3 = sshll.u32 %s1716_s24, 3 }
  0x54   : > { %683 = vmatpush.msra.mxu1 %v663_v3  ;;  %s1229_s15 = sshll.u32 %s624_s19, 1  ;;  %v689_v18 = vld [vmem:[#allocation11] sm:$0xff]  ;;  %v887_v1 = vld [vmem:[#allocation13 + $0x18] sm:$0xff]  ;;  %v886_v2 = vld [vmem:[#allocation13 + $0x10] sm:$0xff]  ;;  %s988_s16 = scalar_lea.hbm %s2104_s12, %s1243_s3 }
  0x55   : > { %655 = vmatpush.msra.mxu0 %v634_v5  ;;  %709 = vmatpush.msra.mxu2 %v691_v16  ;;  %s629_s9 = scalar_lea.vmem %s2102_s10, %s1229_s15  ;;  %v885_v3 = vld [vmem:[#allocation13 + $0x8] sm:$0xff]  ;;  %v884_v4 = vld [vmem:[#allocation13] sm:$0xff]  ;;  %s991_s5 = sshll.u32 %s988_s16, 4  ;;  %s992_s5 = int_to_ptr.hbm [resolvable:$true] %s991_s5 }
  0x56   : > { %684 = vmatpush.msra.mxu1 %v662_v6  ;;  %v716_v20 = vld [vmem:[%s629_s9] sm:$0x3]  ;;  %s989_s6 = sshll.u32 %s2011_s1, 4  ;;  %s962_s0 = scalar_lea.sflag [#allocation16], %s1960_s21  ;;  %s990_s6 = int_to_ptr.vmem [resolvable:$true] %s989_s6 }
  0x57   : > { %1231 = vmatmul.msk.f32.vlgmr.msra.gmra.mxu1 %vm637_vm0, %v631_v7  ;;  %656 = vmatpush.msra.mxu0 %v633_v8  ;;  %v717_v21 = vunpack.c.0.s8 %v716_v20  ;;  %s1612_s8 = sshra.s32 %s992_s5, 4  ;;  %s1618_s19 = scalar_lea.hbm %s2104_s12, 32  ;;  %s1613_s8 = int_to_ptr.hbm [resolvable:$true] %s1612_s8 }
  0x58   : > { %1230 = vmatmul.msk.f32.vlgmr.msra.gmra.mxu0 %vm637_vm0, %v1986_v9  ;;  %710 = vmatpush.msra.mxu2 %v690_v17  ;;  %s1614_s13 = scalar_lea.hbm %s1613_s8, 16  ;;  %p1619_p11 = scmp.lt.s32.totalorder %s1613_s8, %s2104_s12 }
  0x59   : > { %v718_v22 = vcvt.s32.f32 %v717_v21  ;;  %p1615_p3 = scmp.ne.s32.totalorder %s1613_s8, %s1614_s13  ;;  %p1620_p12 = scmp.lt.s32.totalorder %s1618_s19, %s1614_s13 }
  0x5a   : > { %711 = vmatpush.msra.mxu2 %v689_v18 }
  0x5b   : > { %1232 = vmatmul.msk.f32.vlgmr.msra.gmra.mxu2 %vm637_vm0, %v632_v19  ;;  %vm719_vm2 = vcmp.ne.f32.partialorder %v718_v22, 0.0  ;;  %p1616_p5 = pnand %p1615_p3, %p1891_p2  ;;  %p1621_p13 = por %p1620_p12, %p1619_p11 }
  0x5c   : > { %907 = vmatpush.msrb.mxu2 %v887_v1 }
  0x5d   : > { %p1617_p10 = pneg %p1616_p5 }
  0x5e   : > { %908 = vmatpush.msrb.mxu2 %v886_v2 }
  0x5f   : > { %p1622_p0 = pnand %p1621_p13, %p1617_p10 }
  0x60   : > { %909 = vmatpush.msrb.mxu2 %v885_v3 }
  0x62   : > { %910 = vmatpush.msrb.mxu2 %v884_v4 }
  0xd4   : > { %v686_v10 = vpop.f32.mrf.mxu1 }
  0xd5   : > { %799 = vrot.lane.b32.xlu0 %v686_v10, %s1732_s27  ;;  %1233 = vmatpush.xpose.msk.msra.mxu3 %vm720_vm1, %v686_v10  ;;  %v658_v11 = vpop.f32.mrf.mxu0  ;;  %v1373_v10 = vld [vmem:[%s2099_s7] ss:$0 sm:$0xff] }
  0xd6   : > { %v661_v12 = vmul.f32 0.25, %v658_v11 }
  0xd8   : > { %1234 = vmatmul.msk.f32.vlgmr.msra.gmra.mxu3 %vm720_vm1, %v661_v12 }
  0xdd   : > { %797 = vrot.lane.b32.xlu0 %v661_v12, %s1732_s27 }
  0xde   : > { %v713_v30 = vpop.f32.mrf.mxu2 }
  0xdf   : > { %792 = vmatpush.msrb.mxu3 %v713_v30 }
 0x147   : > { %v800_v13 = vpop.permute.xlu0 %799 }
 0x148   : > { %1236 = vmatpush.xpose.msk.msrb.mxu0 %vm720_vm1, %v800_v13 }
 0x14f   : > { %v798_v14 = vpop.permute.xlu0 %797 }
 0x150   : > { %1237 = vmatmul.msk.f32.vlgmr.msrb.gmra.mxu0 %vm720_vm1, %v798_v14 }
 0x15b   : > { %v744_v26 = vpop.f32.mrf.mxu3 }
 0x15c   : > { %v747_v27 = vsel %vm719_vm2, -1e+10, %v744_v26 }
 0x15d   : > { %v749_v28 = vsel %vm748_vm3, %v747_v27, -inf }
 0x1cd   : > { %v822_v23 = vpop.f32.mrf.mxu0 }
 0x1ce   : > { %v825_v24 = vsel %vm719_vm2, -1e+10, %v822_v23 }
 0x1cf   : > { %v826_v25 = vsel %vm748_vm3, %v825_v24, -inf }
 0x1d0   : > { %827 = vmax.xlane.f32.xlu1 %v826_v25 }
 0x1d8   : > { %750 = vmax.xlane.f32.xlu1 %v749_v28 }
 0x243   : > { %v828_v29 = vpop.xlane.xlu1 %827 }
 0x244   : > { %v829_v31 = vsub.f32 %v825_v24, %v828_v29 }
 0x246   : > { %v830_v32 = vmul.f32 1.442695, %v829_v31 }
 0x248   : > { %1376 = vpow2.f32 %v830_v32 }
 0x24b   : > { %v751_v33 = vpop.xlane.xlu1 %750 }
 0x24c   : > { %v752_v34 = vsub.f32 %v747_v27, %v751_v33 }
 0x24e   : > { %v1377_v35 = vpop.eup %1376  ;;  %v753_v36 = vmul.f32 1.442695, %v752_v34 }
 0x24f   : > { %v832_v37 = vsel %vm748_vm3, %v1377_v35, 0.0 }
 0x250   : > { %1378 = vpow2.f32 %v753_v36  ;;  %833 = vadd.xlane.f32.xlu2 %v832_v37 }
 0x256   : > { %v1379_v38 = vpop.eup %1378 }
 0x257   : > { %v755_v39 = vsel %vm748_vm3, %v1379_v38, 0.0 }
 0x258   : > { %756 = vadd.xlane.f32.xlu0 %v755_v39 }
 0x268   : > { %853 = vrot.lane.b32.xlu2 %v713_v30, %s1732_s27 }
 0x2c3   : > { %v834_v40 = vpop.xlane.xlu2 %833 }
 0x2c4   : > { %1380 = vrcp.f32 %v834_v40  ;;  %v846_v46 = vand.u32 2147483648, %v834_v40  ;;  %v844_v48 = vand.u32 2147483647, %v834_v40  ;;  %vm840_vm5 = vweird.f32 %v834_v40 }
 0x2c6   : > { %v847_v51 = vor.u32 1.1754944e-38, %v846_v46  ;;  %vm845_vm7 = vcmp.eq.f32.partialorder %v844_v48, 8.507059e+37 }
 0x2ca   : > { %v1381_v41 = vpop.eup %1380 }
 0x2cb   : > { %v836_v42 = vmul.f32 %v1381_v41, %v834_v40  ;;  %v757_v43 = vpop.xlane.xlu0 %756  ;;  %v854_v44 = vpop.permute.xlu2 %853  ;;  %vm841_vm4 = vweird.f32 %v1381_v41 }
 0x2cc   : > { %1382 = vrcp.f32 %v757_v43  ;;  %874 = vmatpush.msrb.mxu1 %v854_v44  ;;  %vm842_vm6 = vmor %vm840_vm5, %vm841_vm4  ;;  %v769_v57 = vand.u32 2147483648, %v757_v43  ;;  %v767_v59 = vand.u32 2147483647, %v757_v43  ;;  %vm763_vm9 = vweird.f32 %v757_v43 }
 0x2cd   : > { %v837_v45 = vsub.f32 1.0, %v836_v42  ;;  %1384 = vrcp.f32 %v1734_v15 }
 0x2ce   : > { %v770_v61 = vor.u32 1.1754944e-38, %v769_v57  ;;  %vm768_vm11 = vcmp.eq.f32.partialorder %v767_v59, 8.507059e+37 }
 0x2cf   : > { %v838_v47 = vmul.f32 %v1381_v41, %v837_v45 }
 0x2d1   : > { %v839_v49 = vadd.f32 %v1381_v41, %v838_v47 }
 0x2d2   : > { %v1383_v50 = vpop.eup %1382 }
 0x2d3   : > { %v759_v52 = vmul.f32 %v1383_v50, %v757_v43  ;;  %v843_v53 = vsel %vm842_vm6, %v1381_v41, %v839_v49  ;;  %vm764_vm8 = vweird.f32 %v1383_v50  ;;  %v1385_v16 = vpop.eup %1384 }
 0x2d4   : > { %v848_v54 = vsel %vm845_vm7, %v847_v51, %v843_v53  ;;  %vm765_vm10 = vmor %vm763_vm9, %vm764_vm8  ;;  %v920_v17 = vmul.f32 32.0, %v1385_v16  ;;  %vm924_vm12 = vweird.f32 %v1385_v16 }
 0x2d5   : > { %v760_v55 = vsub.f32 1.0, %v759_v52  ;;  %v849_v56 = vmul.f32 %v1377_v35, %v848_v54 }
 0x2d6   : > { %v921_v18 = vsub.f32 1.0, %v920_v17 }
 0x2d7   : > { %v761_v58 = vmul.f32 %v1383_v50, %v760_v55  ;;  %1238 = vst.msk [vmem:[%s2011_s1 + $0x8] sm:$0xff] %vm748_vm3, %v849_v56  ;;  %1239 = vmatmul.msk.f32.vlgmr.msrb.gmra.mxu1 %vm748_vm3, %v849_v56 }
 0x2d8   : > { %v922_v19 = vmul.f32 %v1385_v16, %v921_v18 }
 0x2d9   : > { %v762_v60 = vadd.f32 %v1383_v50, %v761_v58 }
 0x2da   : > { %v923_v20 = vadd.f32 %v1385_v16, %v922_v19 }
 0x2db   : > { %v766_v62 = vsel %vm765_vm10, %v1383_v50, %v762_v60 }
 0x2dc   : > { %v771_v63 = vsel %vm768_vm11, %v770_v61, %v766_v62  ;;  %v925_v21 = vsel %vm924_vm12, %v1385_v16, %v923_v20 }
 0x2dd   : > { %v772_v0 = vmul.f32 %v1379_v38, %v771_v63 }
 0x2df   : > { %773 = vst.msk [vmem:[%s2011_s1] sm:$0xff] %vm748_vm3, %v772_v0  ;;  %1235 = vmatmul.msk.f32.vlgmr.msrb.gmra.mxu3 %vm748_vm3, %v772_v0 }
 0x354   : > { %v876_v5 = vpop.f32.mrf.mxu1 }
 0x355   : > { %880 = vrot.lane.b32.xlu1 %v876_v5, %s1733_s17 }
 0x362   : > { %v794_v6 = vpop.f32.mrf.mxu3 }
 0x3c7   : > { %v881_v7 = vpop.permute.xlu1 %880 }
 0x3c8   : > { %v883_v8 = vsel %vm720_vm1, %v794_v6, %v881_v7 }
 0x3c9   : > { %1240 = vmatmul.msk.f32.vlgmr.msrb.gmra.mxu2 %vm637_vm0, %v883_v8 }
 0x44c   : > { %v912_v11 = vpop.f32.mrf.mxu2 }
 0x44d   : > { %v913_v12 = vadd.f32 %v1373_v10, %v912_v11 }
 0x44f   : > { %v915_v13 = vadd.f32 %v913_v12, %v1986_v9 }
 0x451   : > { %v916_v14 = vsel %vm637_vm0, %v915_v13, 0.0 }
 0x452   : > { %917 = vadd.xlane.f32.xlu2 %v916_v14 }
 0x4c5   : > { %v918_v22 = vpop.xlane.xlu2 %917 }
 0x4c6   : > { %v926_v23 = vmul.f32 %v925_v21, %v918_v22 }
 0x4c8   : > { %v927_v9 = vsub.f32 %v915_v13, %v926_v23 }
 0x4ca   : > { %v928_v24 = vmul.f32 %v927_v9, %v927_v9 }
 0x4cc   : > { %v929_v25 = vsel %vm637_vm0, %v928_v24, 0.0 }
 0x4cd   : > { %930 = vadd.xlane.f32.xlu1 %v929_v25 }
 0x4ce   : > { %1625 = shalt.err (!%p1622_p0)
}
 0x4cf   : > { %s1735_s28 = smov 128   ;;  %s1736_s9 = smov 256  }
 0x4d0   : > { %s1737_s26 = smov 8   ;;  %s2148_s11 = sld [smem:[#allocation35_spill]] }
 0x4d1   : > { %1270 = dma.vmem_to_hbm [thread:$0]  (%p1891_p2), %s990_s6, 256, %s992_s5, %s962_s0, %s1735_s28, %s1736_s9, %s1737_s26  }
 0x4d2   : > { %s2149_s30 = sld [smem:[#allocation37_spill]]  ;;  %s615_s8 = scalar_lea.vmem [#allocation14], %s1963_s4 }
 0x4d3   : > { %s2150_s0 = sld [smem:[#allocation36_spill]]  ;;  %s975_s13 = sshll.u32 %s615_s8, 4  ;;  %s976_s13 = int_to_ptr.vmem [resolvable:$true] %s975_s13 }
 0x4d4   : > { %s957_s24 = scalar_lea.sflag [#allocation4], %s1960_s21 }
 0x4d6   : > { %v1374_v35 = vld [vmem:[%s2148_s11] ss:$0 sm:$0xff] }
 0x4d8   : > { %s973_s16 = scalar_lea.hbm %s2149_s30, %s1243_s3  ;;  %s1646_s4 = scalar_lea.hbm %s2149_s30, 16 }
 0x4d9   : > { %v1375_v38 = vld [vmem:[%s2150_s0] ss:$0 sm:$0xff]  ;;  %s977_s18 = sshll.u32 %s973_s16, 4  ;;  %s978_s18 = int_to_ptr.hbm [resolvable:$true] %s977_s18 }
 0x4da   : > { %s1640_s27 = sshra.s32 %s978_s18, 4  ;;  %s1641_s27 = int_to_ptr.hbm [resolvable:$true] %s1640_s27 }
 0x4db   : > { %s1642_s3 = scalar_lea.hbm %s1641_s27, 8  ;;  %p1647_p1 = scmp.lt.s32.totalorder %s1641_s27, %s2149_s30 }
 0x4dc   : > { %p1643_p4 = scmp.ne.s32.totalorder %s1641_s27, %s1642_s3  ;;  %p1648_p3 = scmp.lt.s32.totalorder %s1646_s4, %s1642_s3 }
 0x4de   : > { %p1644_p9 = pnand %p1643_p4, %p1891_p2  ;;  %p1649_p5 = por %p1648_p3, %p1647_p1 }
 0x4e0   : > { %p1645_p8 = pneg %p1644_p9 }
 0x4e2   : > { %p1650_p10 = pnand %p1649_p5, %p1645_p8 }
 0x540   : > { %v931_v26 = vpop.xlane.xlu1 %930 }
 0x541   : > { %v932_v27 = vmul.f32 %v931_v26, %v925_v21 }
 0x543   : > { %v933_v28 = vadd.f32 1e-05, %v932_v27 }
 0x545   : > { %1386 = vrsqrt.f32 %v933_v28  ;;  %vm940_vm14 = vweird.f32 %v933_v28 }
 0x54b   : > { %v1387_v29 = vpop.eup %1386 }
 0x54c   : > { %v935_v30 = vmul.f32 %v1387_v29, %v933_v28  ;;  %vm941_vm13 = vweird.f32 %v1387_v29 }
 0x54d   : > { %vm942_vm15 = vmor %vm940_vm14, %vm941_vm13 }
 0x54e   : > { %v936_v31 = vmul.f32 %v1387_v29, %v935_v30 }
 0x550   : > { %v937_v32 = vmul.f32 0.5, %v936_v31 }
 0x552   : > { %v938_v33 = vsub.f32 1.5, %v937_v32 }
 0x554   : > { %v939_v34 = vmul.f32 %v1387_v29, %v938_v33 }
 0x556   : > { %v943_v36 = vsel %vm942_vm15, %v1387_v29, %v939_v34 }
 0x557   : > { %v944_v37 = vmul.f32 %v943_v36, %v927_v9 }
 0x559   : > { %v949_v39 = vmul.f32 %v1374_v35, %v944_v37 }
 0x55b   : > { %v954_v40 = vadd.f32 %v1375_v38, %v949_v39 }
 0x55d   : > { %955 = vst.msk [vmem:[%s615_s8] sm:$0xff] %vm637_vm0, %v954_v40 }
 0x55e   : > { %1653 = shalt.err (!%p1650_p10)
}
 0x55f   : > { %1269 = dma.vmem_to_hbm [thread:$0]  (%p1891_p2), %s976_s13, 128, %s978_s18, %s957_s24  }
 0x560 PF: > { %s2151_s21 = sld [smem:[#allocation23_spill]]  ;;  %p1297_p11 = pnand %p1212_p6, %p1898_p7 }
 0x561   : > { %s2153_s26 = sld [smem:[#allocation25_spill]] }
 0x562   : > { %p1298_p12 = pneg %p1297_p11 }
 0x566   : > { %s1006_s1 = sand.u32 1, %s2151_s21  }
 0x567   : > { %s1007_s17 = scalar_lea.sflag [#allocation4], %s1006_s1 }
 0x568   : > { %1695 = dma.done.wait (%p1298_p12), %s1007_s17, 128  }
 0x569   : > { %1697 = vsyncadd (%p1298_p12), %s1007_s17, 4294967168  ;;  %s1017_s11 = scalar_lea.sflag [#allocation16], %s1006_s1 }
 0x56a   : > { %1699 = dma.done.wait (%p1298_p12), %s1017_s11, 256  }
 0x56b   : > { %1701 = vsyncadd (%p1298_p12), %s1017_s11, 4294967040  ;;  %s37_s26 = sadd.s32 1, %s2153_s26   ;;  %s2154_s29 = sld [smem:[#allocation27_spill]] }
 0x56c   : > { %p34_p13 = scmp.ge.s32.totalorder %s37_s26, 4   ;;  %s2155_s24 = sld [smem:[#allocation24_spill]] }
 0x56d   : > { %s2156_s25 = sld [smem:[#allocation26_spill]]  ;;  %s2157_s21 = smov %s1708_s22 }
 0x56e   : > { %s2158_s22 = smov %s1712_s23  ;;  %36 = sbr.rel (!%p34_p13) target bundleno = 22 (0x16), region = 170 }
 0x571   : > { %s2159_s23 = smov %s2154_s29 }
 0x573   :  { %1023 = vsyncpa [#allocation3], 1 }
 0x574   :  { %1025 = vsyncpa [#allocation3 + $0x1], 1 }
 0x575   :  { %1026 = vsyncpa [#allocation6], 1 }
 0x576   :  { %1028 = vsyncpa [#allocation6 + $0x1], 1 }
 0x577   :  { %1029 = vsyncpa [#allocation9], 1 }
 0x578   :  { %1030 = vsyncpa [#allocation12], 1 }
 0x579   :  { %1031 = vsyncpa [#allocation4], 1 }
 0x57a   :  { %1033 = vsyncpa [#allocation4 + $0x1], 1 }
 0x57b   :  { %1034 = vsyncpa [#allocation16], 1 }
 0x57c   :  { %1036 = vsyncpa [#allocation16 + $0x1], 1 }

</bundles_post_ra>
